<compile_context>
chip_gen: v6e
topology: v6e:2x2x1
jax: 0.10.0
libtpu: 0.0.40
codegen_flags: <defaults>
</compile_context>

<pallas_src>
import functools

import jax
import jax.numpy as jnp
from jax.experimental import pallas as pl
from jax.experimental.pallas import tpu as pltpu

SEQUENCE_LENGTH = 5   # temporal saliency slices (TempSAL default)
IMAGE_SIZE = 32       # small synthetic image size


# ----------------------------------------------------------------------------
# Pallas kernel: fused GEMM + bias + activation  (one call per conv layer)
# ----------------------------------------------------------------------------
def _gemm_bias_act_kernel(w_ref, p_ref, b_ref, o_ref, *, activation):
    # w_ref: (Cout, K*K*Cin)  bf16   -- pre-flattened conv weights
    # p_ref: (K*K*Cin, Mb)    bf16   -- im2col patches (lane axis = N*H*W tile)
    # b_ref: (Cout, 1)        f32
    # o_ref: (Cout, Mb)       f32    -- lane-dense output
    acc = jnp.dot(w_ref[...], p_ref[...], preferred_element_type=jnp.float32)
    acc = acc + b_ref[...]                       # (Cout, 1) broadcasts across lanes
    if activation == "relu":
        acc = jnp.maximum(acc, 0.0)
    elif activation == "sigmoid":
        acc = jax.nn.sigmoid(acc)
    o_ref[...] = acc.astype(o_ref.dtype)


def _detect_num_m_tiles(M):
    """2 parallel lane tiles on v7x (2 TCs/chip) when cleanly divisible, else 1."""
    try:
        kind = jax.devices()[0].device_kind.lower()
    except Exception:
        return 1
    if (("v7" in kind) or ("tpu7" in kind)) and (M % 256 == 0):
        return 2
    return 1


def conv2d_bias_act(x_cnhw, w_mat, b_col, *, K, activation):
    """KxK 'same' conv + bias + activation.

    x_cnhw: (Cin, N, H, W) float   (channel-first internal layout)
    w_mat : (Cout, K*K*Cin) bf16   (pre-flattened, MXU-ready)
    b_col : (Cout, 1) f32
    returns (Cout, N, H, W) f32
    """
    Cin, N, H, W = x_cnhw.shape
    Cout, KC = w_mat.shape
    assert KC == K * K * Cin
    M = N * H * W
    p = K // 2

    # im2col in the wrapper (XLA glue): bf16 halves HBM bytes for the big operand.
    xb = x_cnhw.astype(jnp.bfloat16)
    xp = jnp.pad(xb, ((0, 0), (0, 0), (p, p), (p, p)))
    taps = []
    for dy in range(K):                 # row order matches weight flatten (dy, dx, c)
        for dx in range(K):
            taps.append(xp[:, :, dy:dy + H, dx:dx + W].reshape(Cin, M))
    patches = jnp.concatenate(taps, axis=0)            # (K*K*Cin, M) bf16

    m_tiles = _detect_num_m_tiles(M)
    mb = M // m_tiles
    kernel = functools.partial(_gemm_bias_act_kernel, activation=activation)
    out = pl.pallas_call(
        kernel,
        out_shape=jax.ShapeDtypeStruct((Cout, M), jnp.float32),
        grid=(m_tiles,),
        in_specs=[
            pl.BlockSpec((Cout, KC), lambda i: (0, 0)),
            pl.BlockSpec((KC, mb), lambda i: (0, i)),
            pl.BlockSpec((Cout, 1), lambda i: (0, 0)),
        ],
        out_specs=pl.BlockSpec((Cout, mb), lambda i: (0, i)),
        compiler_params=pltpu.CompilerParams(dimension_semantics=("parallel",)),
    )(w_mat, patches, b_col)
    return out.reshape(Cout, N, H, W)


# ----------------------------------------------------------------------------
# Bilinear resize (PyTorch interpolate, mode='bilinear', align_corners=False)
# Works on the last two dims of any (..., H, W) tensor.
# ----------------------------------------------------------------------------
def _src_coords(out_size, in_size):
    scale = in_size / out_size
    src = (jnp.arange(out_size, dtype=jnp.float32) + 0.5) * scale - 0.5
    src = jnp.maximum(src, 0.0)
    i0 = jnp.floor(src).astype(jnp.int32)
    i0 = jnp.minimum(i0, in_size - 1)
    i1 = jnp.minimum(i0 + 1, in_size - 1)
    frac = src - i0.astype(jnp.float32)
    return i0, i1, frac


def bilinear_resize_hw(x, out_h, out_w):
    H, W = x.shape[-2], x.shape[-1]
    if (H, W) == (out_h, out_w):
        return x
    i0, i1, fh = _src_coords(out_h, H)
    j0, j1, fw = _src_coords(out_w, W)
    top = x[..., i0, :]
    bot = x[..., i1, :]
    fh = fh.reshape((1,) * (x.ndim - 2) + (out_h, 1))
    xh = top * (1.0 - fh) + bot * fh
    left = xh[..., :, j0]
    right = xh[..., :, j1]
    fw = fw.reshape((1,) * (x.ndim - 1) + (out_w,))
    return left * (1.0 - fw) + right * fw


# ----------------------------------------------------------------------------
# Module
# ----------------------------------------------------------------------------
class SpatioTemporalMixingModulePallas:
    def __init__(self, hidden_channels_list, feature_channels_list, dropout_rate, key):
        self.hidden_channels_list = list(hidden_channels_list)
        self.feature_channels_list = list(feature_channels_list)
        self.dropout_rate = dropout_rate  # TODO(synk): Dropout2d is stochastic; eval-mode identity is used.

        in_channels_list = [feature_channels_list[-1]] + hidden_channels_list[1:][::-1]
        inc_channels_list = [feature_channels_list[-2]] + feature_channels_list[:-2][::-1]
        inc_channels_list = [inc_channels_list[0]] + [
            c + SEQUENCE_LENGTH + 1 for c in inc_channels_list[1:]
        ]
        out_channels_list = hidden_channels_list[::-1]
        layer_defs = list(zip(in_channels_list, inc_channels_list, out_channels_list))

        n_layers = len(layer_defs)
        keys = jax.random.split(key, 2 * n_layers + 4)

        def init_conv(kw, kb, cin, cout, ksize):
            # PyTorch Conv2d default: uniform(-1/sqrt(fan_in), 1/sqrt(fan_in)).
            bound = 1.0 / float(cin * ksize * ksize) ** 0.5
            w = jax.random.uniform(kw, (ksize, ksize, cin, cout), jnp.float32,
                                   minval=-bound, maxval=bound)
            b = jax.random.uniform(kb, (cout,), jnp.float32,
                                   minval=-bound, maxval=bound)
            # Pre-flatten/transpose weights to the exact MXU layout: (Cout, K*K*Cin) bf16.
            w_mat = w.reshape(ksize * ksize * cin, cout).T.astype(jnp.bfloat16)
            b_col = b.reshape(cout, 1)
            return w_mat, b_col

        self.decoder_params = []
        for li, (cin, cinc, cout) in enumerate(layer_defs):
            self.decoder_params.append(
                init_conv(keys[2 * li], keys[2 * li + 1], cin + cinc, cout, 3))

        final_c = out_channels_list[-1]
        self.final_w1, self.final_b1 = init_conv(keys[-4], keys[-3], final_c, final_c, 5)
        self.final_w2, self.final_b2 = init_conv(keys[-2], keys[-1], final_c, 1, 5)

    def __call__(self, encoded_features_list, temporal_features, global_features):
        # NCHW in / NCHW out (PyTorch convention). Internally everything runs in
        # channel-first (C, N, H, W) so the Pallas GEMM output (Cout, N*H*W) is
        # lane-dense and reshapes for free; inputs are transposed exactly once.
        enc = [jnp.transpose(f, (1, 0, 2, 3)) for f in encoded_features_list]
        g = jnp.transpose(global_features, (1, 0, 2, 3))
        t = jnp.transpose(temporal_features, (1, 0, 2, 3))

        x = enc[-1]
        for i, (w_mat, b_col) in enumerate(self.decoder_params):
            y = enc[-(i + 2)]
            th, tw = int(y.shape[-2]), int(y.shape[-1])
            x = bilinear_resize_hw(x, th, tw)
            if i == 0:
                x = jnp.concatenate([x, y], axis=0)
            else:
                gr = bilinear_resize_hw(g, th, tw)
                tr = bilinear_resize_hw(t, th, tw)
                x = jnp.concatenate([x, y, gr, tr], axis=0)
            x = conv2d_bias_act(x, w_mat, b_col, K=3, activation="relu")

        x = bilinear_resize_hw(x, IMAGE_SIZE, IMAGE_SIZE)
        # TODO(synk): the two final 5x5 convs could be fused into a single pallas_call
        # holding the intermediate in VMEM scratch; kept as two lane-dense GEMM calls.
        x = conv2d_bias_act(x, self.final_w1, self.final_b1, K=5, activation="relu")
        x = conv2d_bias_act(x, self.final_w2, self.final_b2, K=5, activation="sigmoid")
        return jnp.transpose(x, (1, 0, 2, 3))


# ----------------------------------------------------------------------------
# Demo
# ----------------------------------------------------------------------------
if __name__ == "__main__":
    key = jax.random.PRNGKey(0)
    k_param, k_data = jax.random.split(key)

    feature_channels_list = [4, 8, 16, 32, 32]
    hidden_channels_list = [8, 8, 16, 16]
    spatial_sizes = [32, 16, 8, 4, 2]   # encoder pyramid (coarsest last)
    B = 2

    module = SpatioTemporalMixingModulePallas(
        hidden_channels_list, feature_channels_list, dropout_rate=0.1, key=k_param
    )

    data_keys = jax.random.split(k_data, len(feature_channels_list) + 2)
    encoded_features_list = [
        jax.random.normal(data_keys[j], (B, feature_channels_list[j], s, s), jnp.float32)
        for j, s in enumerate(spatial_sizes)
    ]
    temporal_features = jax.random.normal(
        data_keys[-2], (B, SEQUENCE_LENGTH, IMAGE_SIZE, IMAGE_SIZE), jnp.float32
    )
    global_features = jax.random.normal(
        data_keys[-1], (B, 1, IMAGE_SIZE, IMAGE_SIZE), jnp.float32
    )

    out = module(encoded_features_list, temporal_features, global_features)
    out = jax.block_until_ready(out)
    assert out.shape == (B, 1, IMAGE_SIZE, IMAGE_SIZE), out.shape
    assert bool(jnp.all(jnp.isfinite(out)))
    assert bool(jnp.all((out >= 0.0) & (out <= 1.0)))   # sigmoid output range
    print("KERNEL_OK")
</pallas_src>

<mosaic_0001>
module attributes {stable_mosaic.version = 11 : i64} {
  func.func @_gemm_bias_act_kernel(%arg0: i32, %arg1: memref<16x576xbf16, #tpu.memory_space<vmem>>, %arg2: memref<576x32xbf16, #tpu.memory_space<vmem>>, %arg3: memref<16x1xf32, #tpu.memory_space<vmem>>, %arg4: memref<16x32xf32, #tpu.memory_space<vmem>>) attributes {dimension_semantics = [#tpu.dimension_semantics<parallel>], iteration_bounds = array<i64: 1>, scalar_prefetch = 0 : i64, scratch_operands = 0 : i64, tpu.core_type = #tpu.core_type<tc>, window_params = [{pipeline_mode = #tpu.pipeline_mode<synchronous>, transform_indices = @transform_0, window_bounds = array<i64: 16, 576>}, {transform_indices = @transform_1, window_bounds = array<i64: 576, 32>}, {pipeline_mode = #tpu.pipeline_mode<synchronous>, transform_indices = @transform_2, window_bounds = array<i64: 16, 1>}, {transform_indices = @transform_3, window_bounds = array<i64: 16, 32>}]} {
    %c0 = arith.constant 0 : index
    %c0_0 = arith.constant 0 : index
    %0 = vector.load %arg1[%c0, %c0_0] : memref<16x576xbf16, #tpu.memory_space<vmem>>, vector<16x576xbf16>
    %c0_1 = arith.constant 0 : index
    %c0_2 = arith.constant 0 : index
    %1 = vector.load %arg2[%c0_1, %c0_2] : memref<576x32xbf16, #tpu.memory_space<vmem>>, vector<576x32xbf16>
    %cst = arith.constant dense<0.000000e+00> : vector<16x32xf32>
    %2 = tpu.matmul %0, %1, %cst {dimension_numbers = #tpu.dot_dimension_numbers<[1], [0], [0], [1], [0, 0, 1, 1], [], []>} : vector<16x576xbf16>, vector<576x32xbf16>, vector<16x32xf32> -> vector<16x32xf32>
    %c0_3 = arith.constant 0 : index
    %c0_4 = arith.constant 0 : index
    %3 = vector.load %arg3[%c0_3, %c0_4] : memref<16x1xf32, #tpu.memory_space<vmem>>, vector<16x1xf32>
    %4 = vector.broadcast %3 : vector<16x1xf32> to vector<16x32xf32>
    %5 = arith.addf %2, %4 : vector<16x32xf32>
    %cst_5 = arith.constant 0.000000e+00 : f32
    %6 = vector.broadcast %cst_5 : f32 to vector<16x32xf32>
    %7 = arith.maximumf %5, %6 : vector<16x32xf32>
    %c0_6 = arith.constant 0 : index
    %c0_7 = arith.constant 0 : index
    %8 = vector.load %arg4[%c0_6, %c0_7] : memref<16x32xf32, #tpu.memory_space<vmem>>, vector<16x32xf32>
    tpu.vector_store %arg4[%c0_6, %c0_7], %7 {strides = array<i32>} : memref<16x32xf32, #tpu.memory_space<vmem>>, vector<16x32xf32>,
    return
  }
  func.func @transform_0(%arg0: i32) -> (i32, i32) {
    %c0_i32 = arith.constant 0 : i32
    %c0_i32_0 = arith.constant 0 : i32
    %c0_i32_1 = arith.constant 0 : i32
    return %c0_i32, %c0_i32_0 : i32, i32
  }
  func.func @transform_1(%arg0: i32) -> (i32, i32) {
    %c0_i32 = arith.constant 0 : i32
    %c0_i32_0 = arith.constant 0 : i32
    return %c0_i32, %arg0 : i32, i32
  }
  func.func @transform_2(%arg0: i32) -> (i32, i32) {
    %c0_i32 = arith.constant 0 : i32
    %c0_i32_0 = arith.constant 0 : i32
    %c0_i32_1 = arith.constant 0 : i32
    return %c0_i32, %c0_i32_0 : i32, i32
  }
  func.func @transform_3(%arg0: i32) -> (i32, i32) {
    %c0_i32 = arith.constant 0 : i32
    %c0_i32_0 = arith.constant 0 : i32
    return %c0_i32, %arg0 : i32, i32
  }
}

</mosaic_0001>

<bundles_post_ra>
// kernel: tpu_custom_call.1
= control target key start
LH: loop header
LB: loop body
LE: loop exit
PB: predicated region body
PF: predicated region fallthrough
CT: control target
= control target key end

     0   :  { %v670_v5 = vmov 0   ;;  %v671_v34 = vmov 0.0   ;;  %vm672_vm0 = vmmov 0   ;;  %s828_s0 = inlined_call_operand.vmem [shape: bf16[16,576], index: 0, kind: input, shape index: {}]   ;;  %s829_s1 = inlined_call_operand.vmem [shape: bf16[576,32], index: 1, kind: input, shape index: {}]   ;;  %s830_s2 = inlined_call_operand.vmem [shape: f32[16,1], index: 2, kind: input, shape index: {}]   ;;  %s831_s3 = inlined_call_operand.hbm [shape: f32[16,32], index: 3, kind: output, shape index: {}]  }
   0x1   :  { %v605_v0 = vld [vmem:[%s829_s1 + $0x78] sm:$0xff]   ;;  %v609_v4 = vld [vmem:[%s829_s1 + $0x70] sm:$0xff]   ;;  %604 = vset.pattern.permute.xlu0 %v670_v5  ;;  %v613_v9 = vld [vmem:[%s829_s1 + $0x68] sm:$0xff]  }
   0x2   :  { %v606_v1 = vld [vmem:[%s829_s1 + $0x38] sm:$0xff]   ;;  %537 = vmatprep.subr.bf16.mxu0 %v605_v0  ;;  %v610_v6 = vld [vmem:[%s829_s1 + $0x30] sm:$0xff]   ;;  %v614_v10 = vld [vmem:[%s829_s1 + $0x28] sm:$0xff]  }
   0x3   :  { %v607_v2 = vld [vmem:[%s829_s1 + $0xf8] sm:$0xff]   ;;  %538 = vmatpush3.bf16.msra.mxu0 %v606_v1  ;;  %v611_v7 = vld [vmem:[%s829_s1 + $0xf0] sm:$0xff]   ;;  %v615_v11 = vld [vmem:[%s829_s1 + $0xe8] sm:$0xff]  }
   0x4   :  { %v608_v3 = vld [vmem:[%s829_s1 + $0xb8] sm:$0xff]   ;;  %559 = vmatprep.subr.bf16.mxu1 %v607_v2  ;;  %539 = vmatprep.subr.bf16.mxu0 %v609_v4  ;;  %v612_v8 = vld [vmem:[%s829_s1 + $0xb0] sm:$0xff]   ;;  %v616_v12 = vld [vmem:[%s829_s1 + $0xa8] sm:$0xff]  }
   0x5   :  { %560 = vmatpush3.bf16.msra.mxu1 %v608_v3  ;;  %v617_v13 = vld [vmem:[%s829_s1 + $0x60] sm:$0xff]   ;;  %v621_v17 = vld [vmem:[%s829_s1 + $0x58] sm:$0xff]   ;;  %v625_v21 = vld [vmem:[%s829_s1 + $0x50] sm:$0xff]  }
   0x6   :  { %561 = vmatprep.subr.bf16.mxu1 %v611_v7  ;;  %v618_v14 = vld [vmem:[%s829_s1 + $0x20] sm:$0xff]   ;;  %v622_v18 = vld [vmem:[%s829_s1 + $0x18] sm:$0xff]   ;;  %v626_v22 = vld [vmem:[%s829_s1 + $0x10] sm:$0xff]  }
   0x7   :  { %540 = vmatpush3.bf16.msra.mxu0 %v610_v6  ;;  %v619_v15 = vld [vmem:[%s829_s1 + $0xe0] sm:$0xff]   ;;  %v623_v19 = vld [vmem:[%s829_s1 + $0xd8] sm:$0xff]   ;;  %v627_v23 = vld [vmem:[%s829_s1 + $0xd0] sm:$0xff]  }
   0x8   :  { %541 = vmatprep.subr.bf16.mxu0 %v613_v9  ;;  %v620_v16 = vld [vmem:[%s829_s1 + $0xa0] sm:$0xff]   ;;  %v624_v20 = vld [vmem:[%s829_s1 + $0x98] sm:$0xff]   ;;  %v628_v24 = vld [vmem:[%s829_s1 + $0x90] sm:$0xff]  }
   0x9   :  { %562 = vmatpush3.bf16.msra.mxu1 %v612_v8  ;;  %v629_v25 = vld [vmem:[%s829_s1 + $0x48] sm:$0xff]   ;;  %v633_v29 = vld [vmem:[%s829_s1 + $0x40] sm:$0xff]   ;;  %v643_v38 = vld [vmem:[%s829_s1 + $0x118] sm:$0xff]  }
   0xa   :  { %563 = vmatprep.subr.bf16.mxu1 %v615_v11  ;;  %v630_v26 = vld [vmem:[%s829_s1 + $0x8] sm:$0xff]   ;;  %v634_v30 = vld [vmem:[%s829_s1] sm:$0xff]   ;;  %v644_v39 = vld [vmem:[%s829_s1 + $0x110] sm:$0xff]  }
   0xb   :  { %542 = vmatpush3.bf16.msra.mxu0 %v614_v10  ;;  %v631_v27 = vld [vmem:[%s829_s1 + $0xc8] sm:$0xff]   ;;  %v635_v31 = vld [vmem:[%s829_s1 + $0xc0] sm:$0xff]  }
   0xc   :  { %543 = vmatprep.subr.bf16.mxu0 %v617_v13  ;;  %v632_v28 = vld [vmem:[%s829_s1 + $0x88] sm:$0xff]   ;;  %v636_v32 = vld [vmem:[%s828_s0] ss:$20 sps:$4 sm:$0xff]   ;;  %v638_v33 = vld [vmem:[%s828_s0 + $0x4] ss:$20 sps:$4 sm:$0xff]  }
   0xd   :  { %564 = vmatpush3.bf16.msra.mxu1 %v616_v12  ;;  %v639_v35 = vld [vmem:[%s829_s1 + $0x80] sm:$0xff]   ;;  %383 = vmatprep.mubr.bf16.mxu0 %v638_v33  ;;  %v640_v36 = vld [vmem:[%s828_s0 + $0x8] ss:$20 sps:$4 sm:$0xff]  }
   0xe   :  { %565 = vmatprep.subr.bf16.mxu1 %v619_v15  ;;  %v642_v37 = vld [vmem:[%s828_s0 + $0xc] ss:$20 sps:$4 sm:$0xff]  }
   0xf   :  { %544 = vmatpush3.bf16.msra.mxu0 %v618_v14  ;;  %424 = vmatprep.mubr.bf16.mxu1 %v642_v37  ;;  %v94_v40 = vld [vmem:[%s830_s2] sm:$0xff] }
  0x10   :  { %545 = vmatprep.subr.bf16.mxu0 %v621_v17  ;;  %98 = vperm.xlu0 %604, %v94_v40  }
  0x11   :  { %566 = vmatpush3.bf16.msra.mxu1 %v620_v16 }
  0x12   :  { %567 = vmatprep.subr.bf16.mxu1 %v623_v19 }
  0x13   :  { %546 = vmatpush3.bf16.msra.mxu0 %v622_v18 }
  0x14   :  { %547 = vmatprep.subr.bf16.mxu0 %v625_v21 }
  0x15   :  { %568 = vmatpush3.bf16.msra.mxu1 %v624_v20 }
  0x16   :  { %569 = vmatprep.subr.bf16.mxu1 %v627_v23 }
  0x17   :  { %548 = vmatpush3.bf16.msra.mxu0 %v626_v22 }
  0x18   :  { %549 = vmatprep.subr.bf16.mxu0 %v629_v25 }
  0x19   :  { %570 = vmatpush3.bf16.msra.mxu1 %v628_v24 }
  0x1a   :  { %571 = vmatprep.subr.bf16.mxu1 %v631_v27 }
  0x1b   :  { %550 = vmatpush3.bf16.msra.mxu0 %v630_v26 }
  0x1c   :  { %551 = vmatprep.subr.bf16.mxu0 %v633_v29 }
  0x1d   :  { %572 = vmatpush3.bf16.msra.mxu1 %v632_v28 }
  0x1e   :  { %573 = vmatprep.subr.bf16.mxu1 %v635_v31 }
  0x1f   :  { %552 = vmatpush3.bf16.msra.mxu0 %v634_v30 }
  0x20   :  { %586 = vmatprep.subr.bf16.mxu0 %v671_v34 }
  0x21   :  { %574 = vmatpush3.bf16.msra.mxu1 %v639_v35 }
  0x22   :  { %384 = vmatmul.mubr.bf16.vlgmr.msra.gmra.mxu0 %v636_v32 }
  0x23   :  { %594 = vmatprep.mubr.msk.bf16.mxu0 %vm672_vm0, %v671_v34  ;;  %587 = vmatpush3.bf16.msra.mxu0 %v643_v38 }
  0x24   :  { %425 = vmatmul.mubr.bf16.vlgmr.msra.gmra.mxu1 %v640_v36  ;;  %588 = vmatprep.subr.bf16.mxu0 %v671_v34 }
  0x25   :  { %8 = vsyncpa [#allocation3], 0  ;;  %v645_v41 = vld [vmem:[%s829_s1 + $0x108] sm:$0xff]   ;;  %v646_v43 = vld [vmem:[%s829_s1 + $0x100] sm:$0xff]   ;;  %vm347_vm1 = vcmask 523264   ;;  %vm476_vm2 = vcmask 261120  }
  0x26   :  { %v95_v42 = vld [vmem:[%s830_s2 + $0x8] sm:$0xff]  ;;  %v647_v44 = vld [vmem:[%s828_s0 + $0x10] ss:$20 sps:$4 sm:$0xff]   ;;  %s673_s0 = smov [#allocation2]  }
  0x27   :  { %589 = vmatpush3.bf16.msra.mxu0 %v644_v39  ;;  %103 = vperm.xlu0 %604, %v95_v42   ;;  %s484_s1 = sshll.u32 %s673_s0, 4  ;;  %s485_s1 = int_to_ptr.vmem [resolvable:$true] %s484_s1 }
  0x28   :  { %590 = vmatprep.subr.bf16.mxu0 %v671_v34  ;;  %s648_s2 = scalar_lea.vmem %s485_s1, 256  ;;  %p653_p1 = scmp.lt.s32.totalorder %s485_s1, %s485_s1 }
  0x29   :  { %p649_p0 = scmp.ne.s32.totalorder %s485_s1, %s648_s2  ;;  %p654_p2 = scmp.lt.s32.totalorder %s648_s2, %s648_s2 }
  0x2b   :  { %591 = vmatpush3.bf16.msra.mxu0 %v645_v41  ;;  %p655_p3 = por %p654_p2, %p653_p1 }
  0x2c   :  { %592 = vmatprep.subr.bf16.mxu0 %v671_v34 }
  0x2d   :  { %p656_p4 = pnand %p655_p3, %p649_p0 }
  0x2f   :  { %593 = vmatpush3.bf16.msra.mxu0 %v646_v43 }
  0x32   :  { %595 = vmatmul.mubr.msk.bf16.vlgmr.msra.gmra.mxu0 %vm347_vm1, %v647_v44 }
  0x8b   :  { %v99_v50 = vpop.permute.xlu0 %98 }
  0xa2   :  { %v104_v57 = vpop.permute.xlu0 %103 }
  0xe2   :  { %v553_v45 = vpop.f32.mrf.mxu0 }
  0xe4   :  { %v554_v46 = vpop.f32.mrf.mxu0  ;;  %v575_v47 = vpop.f32.mrf.mxu1 }
  0xe5   :  { %v555_v51 = vadd.f32 %v554_v46, %v553_v45 }
  0xe6   :  { %v556_v48 = vpop.f32.mrf.mxu0  ;;  %v576_v49 = vpop.f32.mrf.mxu1 }
  0xe7   :  { %v386_v54 = vadd.f32 %v555_v51, %v99_v50  ;;  %v577_v55 = vadd.f32 %v576_v49, %v575_v47 }
  0xe8   :  { %v557_v52 = vpop.f32.mrf.mxu0  ;;  %v578_v53 = vpop.f32.mrf.mxu1 }
  0xe9   :  { %v558_v56 = vadd.f32 %v557_v52, %v556_v48  ;;  %v427_v61 = vadd.f32 %v577_v55, %v386_v54 }
  0xea   :  { %v579_v58 = vpop.f32.mrf.mxu1 }
  0xeb   :  { %v389_v59 = vadd.f32 %v558_v56, %v104_v57  ;;  %v580_v60 = vadd.f32 %v579_v58, %v578_v53 }
  0xed   :  { %v430_v2 = vadd.f32 %v580_v60, %v389_v59 }
  0xf2   :  { %v467_v62 = vpop.f32.mrf.mxu0 }
  0xf3   :  { %v468_v63 = vadd.f32 %v467_v62, %v427_v61 }
  0xf4   :  { %v596_v0 = vpop.f32.mrf.mxu0 }
  0xf5   :  { %v474_v1 = vmax.f32 %v468_v63, 0.0 }
  0xf6   :  { %v470_v3 = vpop.f32.mrf.mxu0 }
  0xf7   :  { %477 = vst.msk [vmem:[#allocation2] sm:$0xff] %vm476_vm2, %v474_v1  ;;  %v471_v4 = vadd.f32 %v470_v3, %v430_v2 }
  0xf8   :  { %v597_v5 = vpop.f32.mrf.mxu0 }
  0xf9   :  { %v475_v6 = vmax.f32 %v471_v4, 0.0 }
  0xfb   :  { %478 = vst.msk [vmem:[#allocation2 + $0x8] sm:$0xff] %vm476_vm2, %v475_v6 }
  0xfc   :  { %659 = shalt.err (!%p656_p4)
}
  0xfd   :  { %s674_s17 = smov 128   ;;  %s675_s18 = smov 8  }
  0xfe   :  { %490 = dma.vmem_to_hbm [thread:$0]  %s485_s1, 256, %s831_s3, [#allocation3], %s674_s17, %s674_s17, %s675_s18  }
  0xff   :  { %668 = dma.done.wait [#allocation3], 256  }
 0x100   :  { %669 = vsyncadd [#allocation3], 4294967040 }
 0x101   :  { %494 = vsyncpa [#allocation3], 1 }

</bundles_post_ra>
